<compile_context>
chip_gen: v6e
topology: v6e:2x2x1
jax: 0.10.0
libtpu: 0.0.40
codegen_flags: <defaults>
</compile_context>

<pallas_src>
import functools

import jax
import jax.numpy as jnp
from jax.experimental import pallas as pl
from jax.experimental.pallas import tpu as pltpu


def _dice_flip_kernel(x_ref, t_ref, m_ref, out_ref,
                      inter0_ref, prob0_ref,
                      inter1_ref, prob1_ref,
                      inter2_ref, prob2_ref,
                      tsum_ref, msum_ref,
                      *, total_t, smooth, eps, base_w, ind_w, flip_w):
    """Grid = (spatial tiles, 3 heads). Accumulate elementwise partial sums in
    VMEM scratch; reduce + combine into the scalar loss on the last step."""
    s_id = pl.program_id(0)           # spatial tile index
    c_id = pl.program_id(1)           # head index: 0=main, 1=individual, 2=flip
    last_s = pl.num_programs(0) - 1
    last_c = pl.num_programs(1) - 1

    @pl.when((s_id == 0) & (c_id == 0))
    def _init():
        for r in (inter0_ref, prob0_ref, inter1_ref, prob1_ref,
                  inter2_ref, prob2_ref, tsum_ref, msum_ref):
            r[...] = jnp.zeros_like(r)

    # One sigmoid per logit element is the only transcendental in the kernel.
    p = jax.nn.sigmoid(x_ref[...].astype(jnp.float32))          # (N, tile)

    @pl.when(c_id == 0)                                          # main head vs target
    def _main():
        t = t_ref[...].astype(jnp.float32)
        inter0_ref[...] += p * t
        prob0_ref[...] += p
        tsum_ref[...] += t

    @pl.when(c_id == 1)                                          # individual head vs mask
    def _ind():
        m = m_ref[...].astype(jnp.float32)
        inter1_ref[...] += p * m
        prob1_ref[...] += p
        msum_ref[...] += m

    @pl.when(c_id == 2)                                          # flip head vs (1 - target)
    def _flip():
        t = t_ref[...].astype(jnp.float32)
        inter2_ref[...] += p * (1.0 - t)
        prob2_ref[...] += p

    @pl.when((s_id == last_s) & (c_id == last_c))
    def _finalize():
        i0 = jnp.sum(inter0_ref[...]); p0 = jnp.sum(prob0_ref[...])
        i1 = jnp.sum(inter1_ref[...]); p1 = jnp.sum(prob1_ref[...])
        i2 = jnp.sum(inter2_ref[...]); p2 = jnp.sum(prob2_ref[...])
        tsum = jnp.sum(tsum_ref[...])
        msum = jnp.sum(msum_ref[...])
        fsum = total_t - tsum                                    # sum(1 - target)

        def dice_term(inter, psum, ysum):
            score = (2.0 * inter + smooth) / jnp.maximum(psum + ysum + smooth, eps)
            return jnp.where(ysum > 0.0, 1.0 - score, 0.0)

        out_ref[0, 0] = (base_w * dice_term(i0, p0, tsum)
                         + flip_w * dice_term(i2, p2, fsum)
                         + ind_w * dice_term(i1, p1, msum))


def _pick_tile(hw, n, max_bytes=4 << 20):
    """Largest lane tile (multiple of 128) dividing H*W such that the eight
    (n, tile) f32 accumulators stay under ~max_bytes of VMEM scratch."""
    cap = max(128, (max_bytes // (32 * n)))
    cap = (min(cap, hw) // 128) * 128
    if cap <= 0:
        raise ValueError("H*W must be a multiple of 128 for the tiled kernel")
    for ts in range(cap, 0, -128):
        if hw % ts == 0:
            return ts
    raise ValueError("H*W must be a multiple of 128 for the tiled kernel")


def dice_flip_loss_v2(outputs, target, individual_mask, *,
                      smooth=0.0, eps=1e-7,
                      base_weight=0.5, aux_ind_weight=0.1, aux_flip_weight=0.1,
                      tile=None):
    """outputs: (N, 3, H, W) logits (any float dtype); target / individual_mask:
    (N, 1, H, W). Returns the scalar DiceFLIPLossV2 loss (float32)."""
    N, C, H, W = outputs.shape
    assert C == 3, "DiceFLIPLossV2 expects 3 output channels: [main, individual, flip]"
    assert target.shape == (N, 1, H, W) and individual_mask.shape == (N, 1, H, W)
    HW = H * W

    # Zero-copy reshapes (no transpose, no host-side upcast).
    x = outputs.reshape(N, C * HW)          # lanes = [chan0 | chan1 | chan2] per sample
    t = target.reshape(N, HW)
    m = individual_mask.reshape(N, HW)

    if tile is None:
        tile = _pick_tile(HW, N)
    if HW % tile != 0 or tile % 128 != 0:
        raise ValueError("tile must be a multiple of 128 dividing H*W")
    nS = HW // tile
    grid = (nS, C)

    kernel = functools.partial(
        _dice_flip_kernel,
        total_t=float(N * HW), smooth=float(smooth), eps=float(eps),
        base_w=float(base_weight), ind_w=float(aux_ind_weight),
        flip_w=float(aux_flip_weight))

    cost = pl.CostEstimate(
        flops=int(10 * x.size),
        transcendentals=int(x.size),
        bytes_accessed=int(x.size * x.dtype.itemsize
                           + t.size * t.dtype.itemsize
                           + m.size * m.dtype.itemsize + 4))

    out = pl.pallas_call(
        kernel,
        out_shape=jax.ShapeDtypeStruct((1, 1), jnp.float32),
        grid_spec=pltpu.PrefetchScalarGridSpec(
            num_scalar_prefetch=0,
            grid=grid,
            in_specs=[
                pl.BlockSpec((N, tile), lambda s, c: (0, c * nS + s)),   # logits
                pl.BlockSpec((N, tile), lambda s, c: (0, s)),            # target
                pl.BlockSpec((N, tile), lambda s, c: (0, s)),            # individual_mask
            ],
            out_specs=pl.BlockSpec((1, 1), lambda s, c: (0, 0),
                                   memory_space=pltpu.MemorySpace.SMEM),
            scratch_shapes=[pltpu.VMEM((N, tile), jnp.float32)] * 8,
        ),
        compiler_params=pltpu.CompilerParams(
            dimension_semantics=("arbitrary", "arbitrary")),
        cost_estimate=cost,
    )(x, t, m)
    return out[0, 0]


# ----------------------------- pure-JAX reference -----------------------------

def _dice_loss_ref(logits, y_true, smooth=0.0, eps=1e-7):
    bs, nc = logits.shape[0], logits.shape[1]
    yp = jax.nn.sigmoid(logits.astype(jnp.float32)).reshape(bs, nc, -1)
    yt = y_true.astype(jnp.float32).reshape(bs, nc, -1)
    inter = jnp.sum(yp * yt, axis=(0, 2))
    card = jnp.sum(yp, axis=(0, 2)) + jnp.sum(yt, axis=(0, 2))
    score = (2.0 * inter + smooth) / jnp.maximum(card + smooth, eps)
    loss = (1.0 - score) * (jnp.sum(yt, axis=(0, 2)) > 0)
    return jnp.mean(loss)


def _reference_loss(outputs, target, individual_mask, *, base_weight=0.5,
                    aux_ind_weight=0.1, aux_flip_weight=0.1):
    main = _dice_loss_ref(outputs[:, 0:1], target)
    flip = _dice_loss_ref(outputs[:, 2:3], 1.0 - target.astype(jnp.float32))
    ind = _dice_loss_ref(outputs[:, 1:2], individual_mask)
    return main * base_weight + flip * aux_flip_weight + ind * aux_ind_weight


if __name__ == "__main__":
    key = jax.random.PRNGKey(0)
    k1, k2, k3 = jax.random.split(key, 3)
    N, C, H, W = 2, 3, 16, 16
    outputs = jax.random.normal(k1, (N, C, H, W), dtype=jnp.float32).astype(jnp.bfloat16)
    target = jax.random.bernoulli(k2, 0.35, (N, 1, H, W)).astype(jnp.float32)
    individual_mask = jax.random.bernoulli(k3, 0.25, (N, 1, H, W)).astype(jnp.float32)

    # tile=128 forces a multi-step (2 spatial x 3 head) grid on the small demo
    # shape so the accumulate / finalize path is exercised on hardware.
    loss = jax.block_until_ready(
        dice_flip_loss_v2(outputs, target, individual_mask, tile=128))
    ref = jax.block_until_ready(_reference_loss(outputs, target, individual_mask))
    assert jnp.allclose(loss, ref, rtol=1e-3, atol=1e-4), (loss, ref)
    print("KERNEL_OK")
</pallas_src>

<mosaic_0001>
module attributes {stable_mosaic.version = 11 : i64} {
  func.func @_dice_flip_kernel(%arg0: i32, %arg1: i32, %arg2: memref<2x128xbf16, #tpu.memory_space<vmem>>, %arg3: memref<2x128xf32, #tpu.memory_space<vmem>>, %arg4: memref<2x128xf32, #tpu.memory_space<vmem>>, %arg5: memref<1x1xf32, #tpu.memory_space<smem>>, %arg6: memref<2x128xf32, #tpu.memory_space<vmem>>, %arg7: memref<2x128xf32, #tpu.memory_space<vmem>>, %arg8: memref<2x128xf32, #tpu.memory_space<vmem>>, %arg9: memref<2x128xf32, #tpu.memory_space<vmem>>, %arg10: memref<2x128xf32, #tpu.memory_space<vmem>>, %arg11: memref<2x128xf32, #tpu.memory_space<vmem>>, %arg12: memref<2x128xf32, #tpu.memory_space<vmem>>, %arg13: memref<2x128xf32, #tpu.memory_space<vmem>>) attributes {dimension_semantics = [#tpu.dimension_semantics<arbitrary>, #tpu.dimension_semantics<arbitrary>], iteration_bounds = array<i64: 2, 3>, scalar_prefetch = 0 : i64, scratch_operands = 8 : i64, tpu.core_type = #tpu.core_type<tc>, window_params = [{transform_indices = @transform_0, window_bounds = array<i64: 2, 128>}, {transform_indices = @transform_1, window_bounds = array<i64: 2, 128>}, {transform_indices = @transform_2, window_bounds = array<i64: 2, 128>}, {transform_indices = @transform_3, window_bounds = array<i64: 1, 1>}]} {
    %c0_i32 = arith.constant 0 : i32
    %0 = arith.cmpi eq, %arg0, %c0_i32 : i32
    %c0_i32_0 = arith.constant 0 : i32
    %1 = arith.cmpi eq, %arg1, %c0_i32_0 : i32
    %2 = arith.andi %0, %1 : i1
    %3 = arith.extui %2 : i1 to i32
    %c0_i32_1 = arith.constant 0 : i32
    %4 = arith.cmpi ne, %3, %c0_i32_1 : i32
    scf.if %4 {
      %cst_10 = arith.constant 0.000000e+00 : f32
      %26 = vector.broadcast %cst_10 : f32 to vector<2x128xf32>
      %c0_11 = arith.constant 0 : index
      %c0_12 = arith.constant 0 : index
      %27 = vector.load %arg6[%c0_11, %c0_12] : memref<2x128xf32, #tpu.memory_space<vmem>>, vector<2x128xf32>
      tpu.vector_store %arg6[%c0_11, %c0_12], %26 {strides = array<i32>} : memref<2x128xf32, #tpu.memory_space<vmem>>, vector<2x128xf32>,
      %cst_13 = arith.constant 0.000000e+00 : f32
      %28 = vector.broadcast %cst_13 : f32 to vector<2x128xf32>
      %c0_14 = arith.constant 0 : index
      %c0_15 = arith.constant 0 : index
      %29 = vector.load %arg7[%c0_14, %c0_15] : memref<2x128xf32, #tpu.memory_space<vmem>>, vector<2x128xf32>
      tpu.vector_store %arg7[%c0_14, %c0_15], %28 {strides = array<i32>} : memref<2x128xf32, #tpu.memory_space<vmem>>, vector<2x128xf32>,
      %cst_16 = arith.constant 0.000000e+00 : f32
      %30 = vector.broadcast %cst_16 : f32 to vector<2x128xf32>
      %c0_17 = arith.constant 0 : index
      %c0_18 = arith.constant 0 : index
      %31 = vector.load %arg8[%c0_17, %c0_18] : memref<2x128xf32, #tpu.memory_space<vmem>>, vector<2x128xf32>
      tpu.vector_store %arg8[%c0_17, %c0_18], %30 {strides = array<i32>} : memref<2x128xf32, #tpu.memory_space<vmem>>, vector<2x128xf32>,
      %cst_19 = arith.constant 0.000000e+00 : f32
      %32 = vector.broadcast %cst_19 : f32 to vector<2x128xf32>
      %c0_20 = arith.constant 0 : index
      %c0_21 = arith.constant 0 : index
      %33 = vector.load %arg9[%c0_20, %c0_21] : memref<2x128xf32, #tpu.memory_space<vmem>>, vector<2x128xf32>
      tpu.vector_store %arg9[%c0_20, %c0_21], %32 {strides = array<i32>} : memref<2x128xf32, #tpu.memory_space<vmem>>, vector<2x128xf32>,
      %cst_22 = arith.constant 0.000000e+00 : f32
      %34 = vector.broadcast %cst_22 : f32 to vector<2x128xf32>
      %c0_23 = arith.constant 0 : index
      %c0_24 = arith.constant 0 : index
      %35 = vector.load %arg10[%c0_23, %c0_24] : memref<2x128xf32, #tpu.memory_space<vmem>>, vector<2x128xf32>
      tpu.vector_store %arg10[%c0_23, %c0_24], %34 {strides = array<i32>} : memref<2x128xf32, #tpu.memory_space<vmem>>, vector<2x128xf32>,
      %cst_25 = arith.constant 0.000000e+00 : f32
      %36 = vector.broadcast %cst_25 : f32 to vector<2x128xf32>
      %c0_26 = arith.constant 0 : index
      %c0_27 = arith.constant 0 : index
      %37 = vector.load %arg11[%c0_26, %c0_27] : memref<2x128xf32, #tpu.memory_space<vmem>>, vector<2x128xf32>
      tpu.vector_store %arg11[%c0_26, %c0_27], %36 {strides = array<i32>} : memref<2x128xf32, #tpu.memory_space<vmem>>, vector<2x128xf32>,
      %cst_28 = arith.constant 0.000000e+00 : f32
      %38 = vector.broadcast %cst_28 : f32 to vector<2x128xf32>
      %c0_29 = arith.constant 0 : index
      %c0_30 = arith.constant 0 : index
      %39 = vector.load %arg12[%c0_29, %c0_30] : memref<2x128xf32, #tpu.memory_space<vmem>>, vector<2x128xf32>
      tpu.vector_store %arg12[%c0_29, %c0_30], %38 {strides = array<i32>} : memref<2x128xf32, #tpu.memory_space<vmem>>, vector<2x128xf32>,
      %cst_31 = arith.constant 0.000000e+00 : f32
      %40 = vector.broadcast %cst_31 : f32 to vector<2x128xf32>
      %c0_32 = arith.constant 0 : index
      %c0_33 = arith.constant 0 : index
      %41 = vector.load %arg13[%c0_32, %c0_33] : memref<2x128xf32, #tpu.memory_space<vmem>>, vector<2x128xf32>
      tpu.vector_store %arg13[%c0_32, %c0_33], %40 {strides = array<i32>} : memref<2x128xf32, #tpu.memory_space<vmem>>, vector<2x128xf32>,
    } else {
    }
    %c0 = arith.constant 0 : index
    %c0_2 = arith.constant 0 : index
    %5 = vector.load %arg2[%c0, %c0_2] : memref<2x128xbf16, #tpu.memory_space<vmem>>, vector<2x128xbf16>
    %6 = arith.extf %5 : vector<2x128xbf16> to vector<2x128xf32>
    %7 = arith.negf %6 : vector<2x128xf32>
    %8 = math.exp %7 : vector<2x128xf32>
    %cst = arith.constant 1.000000e+00 : f32
    %9 = vector.broadcast %cst : f32 to vector<2x128xf32>
    %10 = arith.addf %9, %8 : vector<2x128xf32>
    %11 = arith.divf %9, %10 : vector<2x128xf32>
    %c0_i32_3 = arith.constant 0 : i32
    %12 = arith.cmpi eq, %arg1, %c0_i32_3 : i32
    %13 = arith.extui %12 : i1 to i32
    %c0_i32_4 = arith.constant 0 : i32
    %14 = arith.cmpi ne, %13, %c0_i32_4 : i32
    scf.if %14 {
      %c0_10 = arith.constant 0 : index
      %c0_11 = arith.constant 0 : index
      %26 = vector.load %arg3[%c0_10, %c0_11] : memref<2x128xf32, #tpu.memory_space<vmem>>, vector<2x128xf32>
      %c0_12 = arith.constant 0 : index
      %c0_13 = arith.constant 0 : index
      %27 = vector.load %arg6[%c0_12, %c0_13] : memref<2x128xf32, #tpu.memory_space<vmem>>, vector<2x128xf32>
      %28 = arith.mulf %11, %26 : vector<2x128xf32>
      %29 = arith.addf %27, %28 : vector<2x128xf32>
      %c0_14 = arith.constant 0 : index
      %c0_15 = arith.constant 0 : index
      %30 = vector.load %arg6[%c0_14, %c0_15] : memref<2x128xf32, #tpu.memory_space<vmem>>, vector<2x128xf32>
      tpu.vector_store %arg6[%c0_14, %c0_15], %29 {strides = array<i32>} : memref<2x128xf32, #tpu.memory_space<vmem>>, vector<2x128xf32>,
      %c0_16 = arith.constant 0 : index
      %c0_17 = arith.constant 0 : index
      %31 = vector.load %arg7[%c0_16, %c0_17] : memref<2x128xf32, #tpu.memory_space<vmem>>, vector<2x128xf32>
      %32 = arith.addf %31, %11 : vector<2x128xf32>
      %c0_18 = arith.constant 0 : index
      %c0_19 = arith.constant 0 : index
      %33 = vector.load %arg7[%c0_18, %c0_19] : memref<2x128xf32, #tpu.memory_space<vmem>>, vector<2x128xf32>
      tpu.vector_store %arg7[%c0_18, %c0_19], %32 {strides = array<i32>} : memref<2x128xf32, #tpu.memory_space<vmem>>, vector<2x128xf32>,
      %c0_20 = arith.constant 0 : index
      %c0_21 = arith.constant 0 : index
      %34 = vector.load %arg12[%c0_20, %c0_21] : memref<2x128xf32, #tpu.memory_space<vmem>>, vector<2x128xf32>
      %35 = arith.addf %34, %26 : vector<2x128xf32>
      %c0_22 = arith.constant 0 : index
      %c0_23 = arith.constant 0 : index
      %36 = vector.load %arg12[%c0_22, %c0_23] : memref<2x128xf32, #tpu.memory_space<vmem>>, vector<2x128xf32>
      tpu.vector_store %arg12[%c0_22, %c0_23], %35 {strides = array<i32>} : memref<2x128xf32, #tpu.memory_space<vmem>>, vector<2x128xf32>,
    } else {
    }
    %c1_i32 = arith.constant 1 : i32
    %15 = arith.cmpi eq, %arg1, %c1_i32 : i32
    %16 = arith.extui %15 : i1 to i32
    %c0_i32_5 = arith.constant 0 : i32
    %17 = arith.cmpi ne, %16, %c0_i32_5 : i32
    scf.if %17 {
      %c0_10 = arith.constant 0 : index
      %c0_11 = arith.constant 0 : index
      %26 = vector.load %arg4[%c0_10, %c0_11] : memref<2x128xf32, #tpu.memory_space<vmem>>, vector<2x128xf32>
      %c0_12 = arith.constant 0 : index
      %c0_13 = arith.constant 0 : index
      %27 = vector.load %arg8[%c0_12, %c0_13] : memref<2x128xf32, #tpu.memory_space<vmem>>, vector<2x128xf32>
      %28 = arith.mulf %11, %26 : vector<2x128xf32>
      %29 = arith.addf %27, %28 : vector<2x128xf32>
      %c0_14 = arith.constant 0 : index
      %c0_15 = arith.constant 0 : index
      %30 = vector.load %arg8[%c0_14, %c0_15] : memref<2x128xf32, #tpu.memory_space<vmem>>, vector<2x128xf32>
      tpu.vector_store %arg8[%c0_14, %c0_15], %29 {strides = array<i32>} : memref<2x128xf32, #tpu.memory_space<vmem>>, vector<2x128xf32>,
      %c0_16 = arith.constant 0 : index
      %c0_17 = arith.constant 0 : index
      %31 = vector.load %arg9[%c0_16, %c0_17] : memref<2x128xf32, #tpu.memory_space<vmem>>, vector<2x128xf32>
      %32 = arith.addf %31, %11 : vector<2x128xf32>
      %c0_18 = arith.constant 0 : index
      %c0_19 = arith.constant 0 : index
      %33 = vector.load %arg9[%c0_18, %c0_19] : memref<2x128xf32, #tpu.memory_space<vmem>>, vector<2x128xf32>
      tpu.vector_store %arg9[%c0_18, %c0_19], %32 {strides = array<i32>} : memref<2x128xf32, #tpu.memory_space<vmem>>, vector<2x128xf32>,
      %c0_20 = arith.constant 0 : index
      %c0_21 = arith.constant 0 : index
      %34 = vector.load %arg13[%c0_20, %c0_21] : memref<2x128xf32, #tpu.memory_space<vmem>>, vector<2x128xf32>
      %35 = arith.addf %34, %26 : vector<2x128xf32>
      %c0_22 = arith.constant 0 : index
      %c0_23 = arith.constant 0 : index
      %36 = vector.load %arg13[%c0_22, %c0_23] : memref<2x128xf32, #tpu.memory_space<vmem>>, vector<2x128xf32>
      tpu.vector_store %arg13[%c0_22, %c0_23], %35 {strides = array<i32>} : memref<2x128xf32, #tpu.memory_space<vmem>>, vector<2x128xf32>,
    } else {
    }
    %c2_i32 = arith.constant 2 : i32
    %18 = arith.cmpi eq, %arg1, %c2_i32 : i32
    %19 = arith.extui %18 : i1 to i32
    %c0_i32_6 = arith.constant 0 : i32
    %20 = arith.cmpi ne, %19, %c0_i32_6 : i32
    scf.if %20 {
      %c0_10 = arith.constant 0 : index
      %c0_11 = arith.constant 0 : index
      %26 = vector.load %arg3[%c0_10, %c0_11] : memref<2x128xf32, #tpu.memory_space<vmem>>, vector<2x128xf32>
      %c0_12 = arith.constant 0 : index
      %c0_13 = arith.constant 0 : index
      %27 = vector.load %arg10[%c0_12, %c0_13] : memref<2x128xf32, #tpu.memory_space<vmem>>, vector<2x128xf32>
      %cst_14 = arith.constant 1.000000e+00 : f32
      %28 = vector.broadcast %cst_14 : f32 to vector<2x128xf32>
      %29 = arith.subf %28, %26 : vector<2x128xf32>
      %30 = arith.mulf %11, %29 : vector<2x128xf32>
      %31 = arith.addf %27, %30 : vector<2x128xf32>
      %c0_15 = arith.constant 0 : index
      %c0_16 = arith.constant 0 : index
      %32 = vector.load %arg10[%c0_15, %c0_16] : memref<2x128xf32, #tpu.memory_space<vmem>>, vector<2x128xf32>
      tpu.vector_store %arg10[%c0_15, %c0_16], %31 {strides = array<i32>} : memref<2x128xf32, #tpu.memory_space<vmem>>, vector<2x128xf32>,
      %c0_17 = arith.constant 0 : index
      %c0_18 = arith.constant 0 : index
      %33 = vector.load %arg11[%c0_17, %c0_18] : memref<2x128xf32, #tpu.memory_space<vmem>>, vector<2x128xf32>
      %34 = arith.addf %33, %11 : vector<2x128xf32>
      %c0_19 = arith.constant 0 : index
      %c0_20 = arith.constant 0 : index
      %35 = vector.load %arg11[%c0_19, %c0_20] : memref<2x128xf32, #tpu.memory_space<vmem>>, vector<2x128xf32>
      tpu.vector_store %arg11[%c0_19, %c0_20], %34 {strides = array<i32>} : memref<2x128xf32, #tpu.memory_space<vmem>>, vector<2x128xf32>,
    } else {
    }
    %c1_i32_7 = arith.constant 1 : i32
    %21 = arith.cmpi eq, %arg0, %c1_i32_7 : i32
    %c2_i32_8 = arith.constant 2 : i32
    %22 = arith.cmpi eq, %arg1, %c2_i32_8 : i32
    %23 = arith.andi %21, %22 : i1
    %24 = arith.extui %23 : i1 to i32
    %c0_i32_9 = arith.constant 0 : i32
    %25 = arith.cmpi ne, %24, %c0_i32_9 : i32
    scf.if %25 {
      %c0_10 = arith.constant 0 : index
      %c0_11 = arith.constant 0 : index
      %26 = vector.load %arg6[%c0_10, %c0_11] : memref<2x128xf32, #tpu.memory_space<vmem>>, vector<2x128xf32>
      %27 = vector.shape_cast %26 : vector<2x128xf32> to vector<1x2x128xf32>
      %cst_12 = arith.constant dense<0.000000e+00> : vector<1xf32>
      %28 = vector.multi_reduction <add>, %27, %cst_12 [1, 2] : vector<1x2x128xf32> to vector<1xf32>
      %29 = vector.shape_cast %28 : vector<1xf32> to vector<1x1x1xf32>
      %30 = vector.extract %29[0, 0, 0] : f32 from vector<1x1x1xf32>
      %c0_13 = arith.constant 0 : index
      %c0_14 = arith.constant 0 : index
      %31 = vector.load %arg7[%c0_13, %c0_14] : memref<2x128xf32, #tpu.memory_space<vmem>>, vector<2x128xf32>
      %32 = vector.shape_cast %31 : vector<2x128xf32> to vector<1x2x128xf32>
      %cst_15 = arith.constant dense<0.000000e+00> : vector<1xf32>
      %33 = vector.multi_reduction <add>, %32, %cst_15 [1, 2] : vector<1x2x128xf32> to vector<1xf32>
      %34 = vector.shape_cast %33 : vector<1xf32> to vector<1x1x1xf32>
      %35 = vector.extract %34[0, 0, 0] : f32 from vector<1x1x1xf32>
      %c0_16 = arith.constant 0 : index
      %c0_17 = arith.constant 0 : index
      %36 = vector.load %arg8[%c0_16, %c0_17] : memref<2x128xf32, #tpu.memory_space<vmem>>, vector<2x128xf32>
      %37 = vector.shape_cast %36 : vector<2x128xf32> to vector<1x2x128xf32>
      %cst_18 = arith.constant dense<0.000000e+00> : vector<1xf32>
      %38 = vector.multi_reduction <add>, %37, %cst_18 [1, 2] : vector<1x2x128xf32> to vector<1xf32>
      %39 = vector.shape_cast %38 : vector<1xf32> to vector<1x1x1xf32>
      %40 = vector.extract %39[0, 0, 0] : f32 from vector<1x1x1xf32>
      %c0_19 = arith.constant 0 : index
      %c0_20 = arith.constant 0 : index
      %41 = vector.load %arg9[%c0_19, %c0_20] : memref<2x128xf32, #tpu.memory_space<vmem>>, vector<2x128xf32>
      %42 = vector.shape_cast %41 : vector<2x128xf32> to vector<1x2x128xf32>
      %cst_21 = arith.constant dense<0.000000e+00> : vector<1xf32>
      %43 = vector.multi_reduction <add>, %42, %cst_21 [1, 2] : vector<1x2x128xf32> to vector<1xf32>
      %44 = vector.shape_cast %43 : vector<1xf32> to vector<1x1x1xf32>
      %45 = vector.extract %44[0, 0, 0] : f32 from vector<1x1x1xf32>
      %c0_22 = arith.constant 0 : index
      %c0_23 = arith.constant 0 : index
      %46 = vector.load %arg10[%c0_22, %c0_23] : memref<2x128xf32, #tpu.memory_space<vmem>>, vector<2x128xf32>
      %47 = vector.shape_cast %46 : vector<2x128xf32> to vector<1x2x128xf32>
      %cst_24 = arith.constant dense<0.000000e+00> : vector<1xf32>
      %48 = vector.multi_reduction <add>, %47, %cst_24 [1, 2] : vector<1x2x128xf32> to vector<1xf32>
      %49 = vector.shape_cast %48 : vector<1xf32> to vector<1x1x1xf32>
      %50 = vector.extract %49[0, 0, 0] : f32 from vector<1x1x1xf32>
      %c0_25 = arith.constant 0 : index
      %c0_26 = arith.constant 0 : index
      %51 = vector.load %arg11[%c0_25, %c0_26] : memref<2x128xf32, #tpu.memory_space<vmem>>, vector<2x128xf32>
      %52 = vector.shape_cast %51 : vector<2x128xf32> to vector<1x2x128xf32>
      %cst_27 = arith.constant dense<0.000000e+00> : vector<1xf32>
      %53 = vector.multi_reduction <add>, %52, %cst_27 [1, 2] : vector<1x2x128xf32> to vector<1xf32>
      %54 = vector.shape_cast %53 : vector<1xf32> to vector<1x1x1xf32>
      %55 = vector.extract %54[0, 0, 0] : f32 from vector<1x1x1xf32>
      %c0_28 = arith.constant 0 : index
      %c0_29 = arith.constant 0 : index
      %56 = vector.load %arg12[%c0_28, %c0_29] : memref<2x128xf32, #tpu.memory_space<vmem>>, vector<2x128xf32>
      %57 = vector.shape_cast %56 : vector<2x128xf32> to vector<1x2x128xf32>
      %cst_30 = arith.constant dense<0.000000e+00> : vector<1xf32>
      %58 = vector.multi_reduction <add>, %57, %cst_30 [1, 2] : vector<1x2x128xf32> to vector<1xf32>
      %59 = vector.shape_cast %58 : vector<1xf32> to vector<1x1x1xf32>
      %60 = vector.extract %59[0, 0, 0] : f32 from vector<1x1x1xf32>
      %c0_31 = arith.constant 0 : index
      %c0_32 = arith.constant 0 : index
      %61 = vector.load %arg13[%c0_31, %c0_32] : memref<2x128xf32, #tpu.memory_space<vmem>>, vector<2x128xf32>
      %62 = vector.shape_cast %61 : vector<2x128xf32> to vector<1x2x128xf32>
      %cst_33 = arith.constant dense<0.000000e+00> : vector<1xf32>
      %63 = vector.multi_reduction <add>, %62, %cst_33 [1, 2] : vector<1x2x128xf32> to vector<1xf32>
      %64 = vector.shape_cast %63 : vector<1xf32> to vector<1x1x1xf32>
      %65 = vector.extract %64[0, 0, 0] : f32 from vector<1x1x1xf32>
      %cst_34 = arith.constant 5.120000e+02 : f32
      %66 = arith.subf %cst_34, %60 : f32
      %cst_35 = arith.constant 2.000000e+00 : f32
      %67 = arith.mulf %cst_35, %30 : f32
      %cst_36 = arith.constant 0.000000e+00 : f32
      %68 = arith.addf %67, %cst_36 : f32
      %69 = arith.addf %35, %60 : f32
      %cst_37 = arith.constant 0.000000e+00 : f32
      %70 = arith.addf %69, %cst_37 : f32
      %cst_38 = arith.constant 1.000000e-07 : f32
      %71 = arith.maximumf %70, %cst_38 : f32
      %72 = arith.divf %68, %71 : f32
      %cst_39 = arith.constant 0.000000e+00 : f32
      %73 = arith.cmpf ogt, %60, %cst_39 : f32
      %cst_40 = arith.constant 1.000000e+00 : f32
      %74 = arith.subf %cst_40, %72 : f32
      %cst_41 = arith.constant 0.000000e+00 : f32
      %75 = arith.select %73, %74, %cst_41 : f32
      %cst_42 = arith.constant 5.000000e-01 : f32
      %76 = arith.mulf %cst_42, %75 : f32
      %cst_43 = arith.constant 2.000000e+00 : f32
      %77 = arith.mulf %cst_43, %50 : f32
      %cst_44 = arith.constant 0.000000e+00 : f32
      %78 = arith.addf %77, %cst_44 : f32
      %79 = arith.addf %55, %66 : f32
      %cst_45 = arith.constant 0.000000e+00 : f32
      %80 = arith.addf %79, %cst_45 : f32
      %cst_46 = arith.constant 1.000000e-07 : f32
      %81 = arith.maximumf %80, %cst_46 : f32
      %82 = arith.divf %78, %81 : f32
      %cst_47 = arith.constant 0.000000e+00 : f32
      %83 = arith.cmpf ogt, %66, %cst_47 : f32
      %cst_48 = arith.constant 1.000000e+00 : f32
      %84 = arith.subf %cst_48, %82 : f32
      %cst_49 = arith.constant 0.000000e+00 : f32
      %85 = arith.select %83, %84, %cst_49 : f32
      %cst_50 = arith.constant 1.000000e-01 : f32
      %86 = arith.mulf %cst_50, %85 : f32
      %87 = arith.addf %76, %86 : f32
      %cst_51 = arith.constant 2.000000e+00 : f32
      %88 = arith.mulf %cst_51, %40 : f32
      %cst_52 = arith.constant 0.000000e+00 : f32
      %89 = arith.addf %88, %cst_52 : f32
      %90 = arith.addf %45, %65 : f32
      %cst_53 = arith.constant 0.000000e+00 : f32
      %91 = arith.addf %90, %cst_53 : f32
      %cst_54 = arith.constant 1.000000e-07 : f32
      %92 = arith.maximumf %91, %cst_54 : f32
      %93 = arith.divf %89, %92 : f32
      %cst_55 = arith.constant 0.000000e+00 : f32
      %94 = arith.cmpf ogt, %65, %cst_55 : f32
      %cst_56 = arith.constant 1.000000e+00 : f32
      %95 = arith.subf %cst_56, %93 : f32
      %cst_57 = arith.constant 0.000000e+00 : f32
      %96 = arith.select %94, %95, %cst_57 : f32
      %cst_58 = arith.constant 1.000000e-01 : f32
      %97 = arith.mulf %cst_58, %96 : f32
      %98 = arith.addf %87, %97 : f32
      %c0_59 = arith.constant 0 : index
      %c0_60 = arith.constant 0 : index
      %99 = memref.load %arg5[%c0_59, %c0_60] : memref<1x1xf32, #tpu.memory_space<smem>>
      memref.store %98, %arg5[%c0_59, %c0_60] : memref<1x1xf32, #tpu.memory_space<smem>>
    } else {
    }
    return
  }
  func.func @transform_0(%arg0: i32, %arg1: i32) -> (i32, i32) {
    %c2_i32 = arith.constant 2 : i32
    %0 = arith.muli %arg1, %c2_i32 : i32
    %1 = arith.addi %0, %arg0 : i32
    %c0_i32 = arith.constant 0 : i32
    %c0_i32_0 = arith.constant 0 : i32
    return %c0_i32, %1 : i32, i32
  }
  func.func @transform_1(%arg0: i32, %arg1: i32) -> (i32, i32) {
    %c0_i32 = arith.constant 0 : i32
    %c0_i32_0 = arith.constant 0 : i32
    return %c0_i32, %arg0 : i32, i32
  }
  func.func @transform_2(%arg0: i32, %arg1: i32) -> (i32, i32) {
    %c0_i32 = arith.constant 0 : i32
    %c0_i32_0 = arith.constant 0 : i32
    return %c0_i32, %arg0 : i32, i32
  }
  func.func @transform_3(%arg0: i32, %arg1: i32) -> (i32, i32) {
    %c0_i32 = arith.constant 0 : i32
    %c0_i32_0 = arith.constant 0 : i32
    %c0_i32_1 = arith.constant 0 : i32
    return %c0_i32, %c0_i32_0 : i32, i32
  }
}

</mosaic_0001>

<bundles_post_ra>
// kernel: tpu_custom_call.1
= control target key start
LH: loop header
LB: loop body
LE: loop exit
PB: predicated region body
PF: predicated region fallthrough
CT: control target
= control target key end

     0   :  { %s1244_s0 = inlined_call_operand.hbm [shape: bf16[2,768], index: 0, kind: input, shape index: {}]   ;;  %s1245_s1 = inlined_call_operand.hbm [shape: f32[2,256], index: 1, kind: input, shape index: {}]   ;;  %s1246_s2 = inlined_call_operand.hbm [shape: f32[2,256], index: 2, kind: input, shape index: {}]   ;;  %s1247_s3 = inlined_call_operand.hbm [shape: f32[1,1], index: 3, kind: output, shape index: {}]  }
   0x1   :  { %1256 = sst [smem:[#allocation26_spill]] %s1245_s1 }
   0x2   :  { %1257 = sst [smem:[#allocation27_spill]] %s1247_s3 }
   0x3   :  { %8 = vsyncpa [#allocation11], 0 }
   0x4   :  { %10 = vsyncpa [#allocation11 + $0x1], 0 }
   0x5   :  { %11 = vsyncpa [#allocation14], 0 }
   0x6   :  { %13 = vsyncpa [#allocation14 + $0x1], 0 }
   0x7   :  { %14 = vsyncpa [#allocation12], 0  ;;  %s962_s12 = smov 0   ;;  %s964_s13 = smov 0  }
   0x8   :  { %s966_s14 = smov 0   ;;  %s968_s15 = smov 0  }
   0x9   :  { %s970_s16 = smov 0   ;;  %s972_s17 = smov 0  }
   0xa   :  { %s974_s18 = smov 0   ;;  %s976_s19 = smov 0  }
   0xb   :  { %s978_s20 = smov 0   ;;  %s980_s21 = smov 0  }
   0xc   :  { %s982_s22 = smov 0  }
   0xd LB: > { %1258 = sst [smem:[#allocation20_spill]] %s898_s13  ;;  %s1016_s23 = sadd.s32 4294967295, %s934_s22   ;;  %s934_s22 = sphi %s982_s22, %s20_s22   ;;  %s930_s21 = sphi %s980_s21, %s1292_s21   ;;  %s926_s20 = sphi %s978_s20, %s1285_s20   ;;  %s922_s19 = sphi %s976_s19, %s1291_s19   ;;  %s918_s18 = sphi %s974_s18, %s1284_s18   ;;  %s914_s17 = sphi %s972_s17, %s1290_s17   ;;  %s910_s16 = sphi %s970_s16, %s1289_s16   ;;  %s906_s15 = sphi %s968_s15, %s1288_s15   ;;  %s902_s14 = sphi %s966_s14, %s1287_s14   ;;  %s898_s13 = sphi %s964_s13, %s1286_s13   ;;  %s894_s12 = sphi %s962_s12, %s1283_s12  }
   0xe   : > { %1259 = sst [smem:[#allocation21_spill]] %s918_s18  ;;  %p51_p0 = scmp.eq.s32.totalorder %s934_s22, 0 }
   0xf   : > { %1260 = sst [smem:[#allocation22_spill]] %s922_s19  ;;  %p57_p1 = scmp.eq.s32.totalorder %s1016_s23, 0 }
  0x10   : > { %1261 = sst [smem:[#allocation23_spill]] %s926_s20  ;;  %p76_p2 = scmp.ne.s32.totalorder %s902_s14, %s898_s13 }
  0x11   : > { %p82_p3 = scmp.ne.s32.totalorder %s898_s13, %s894_s12  ;;  %p638_p4 = scmp.lt.s32.totalorder %s934_s22, 6 }
  0x12   : > { %p78_p5 = por %p76_p2, %p51_p0  ;;  %s172_s25 = sand.u32 1, %s934_s22  }
  0x13   : > { %p1028_p6 = por %p82_p3, %p57_p1  ;;  %s174_s26 = sand.u32 1, %s902_s14  }
  0x14   : > { %s1034_s27 = sshll.u32 %s174_s26, 1  ;;  %s1248_s28 = sshll.u32 %s930_s21, 5 }
  0x15   : > { %s1262_s24 = scalar_select %p1028_p6, 1, 0 }
  0x16   : > { %s1264_s1 = sld [smem:[#allocation26_spill]]  ;;  %s176_s5 = scalar_lea.vmem [#allocation13], %s1034_s27 }
  0x17   : > { %1263 = sst [smem:[#allocation24_spill]] %s1262_s24  ;;  %s183_s6 = sshll.u32 %s176_s5, 4  ;;  %s184_s6 = int_to_ptr.vmem [resolvable:$true] %s183_s6 }
  0x18   : > { %p1045_p7 = pnand %p638_p4, %p78_p5  ;;  %s69_s8 = sadd.s32 1, %s902_s14 }
  0x19   : > { %p585_p8 = scmp.ge.s32.totalorder %s934_s22, 1  ;;  %s1051_s9 = scalar_lea.sflag [#allocation14], %s172_s25 }
  0x1a   : > { %p1255_p9 = pneg %p1045_p7  ;;  %s755_s10 = scalar_lea.vmem %s184_s6, 32 }
  0x1b   : > { %p756_p10 = scmp.ne.s32.totalorder %s184_s6, %s755_s10  ;;  %s936_s11 = smov [#allocation13]  }
  0x1c   : > { %s181_s4 = scalar_lea.hbm %s1264_s1, %s1248_s28  ;;  %s760_s12 = sshll.u32 %s936_s11, 4  ;;  %s761_s12 = int_to_ptr.vmem [resolvable:$false] %s760_s12 }
  0x1d   : > { %p758_p11 = pnand %p756_p10, %p1255_p9  ;;  %s762_s26 = scalar_lea.vmem %s761_s12, 64 }
  0x1e   : > { %p763_p13 = scmp.lt.s32.totalorder %s184_s6, %s761_s12  ;;  %p764_p2 = scmp.lt.s32.totalorder %s762_s26, %s755_s10 }
  0x1f   : > { %p759_p12 = pneg %p758_p11 }
  0x20   : > { %p765_p3 = por %p764_p2, %p763_p13 }
  0x22   : > { %p766_p5 = pnand %p765_p3, %p759_p12 }
  0x24   : > { %769 = shalt.err (!%p766_p5)
}
  0x25   : > { %634 = dma.hbm_to_vmem [thread:$0]  (!%p1045_p7), %s181_s4, 32, %s184_s6, %s1051_s9  }
  0x26   : > { %p206_p10 = scmp.lt.s32.totalorder %s934_s22, 7  ;;  %s29_s29 = sadd.s32 1, %s926_s20 }
  0x27   : > { %s32_s30 = sadd.s32 1, %s930_s21  ;;  %p30_p12 = scmp.ge.s32.totalorder %s29_s29, 3 }
  0x28   : > { %p1064_p11 = pnand %p585_p8, %p206_p10  ;;  %s575_s5 = sshll.u32 %s926_s20, 1 }
  0x29   : > { %s37_s10 = sadd.s32 %s930_s21, %s575_s5  ;;  %s43_s11 = sadd.s32 1, %s914_s17 }
  0x2a   : > { %s1294_s29 = smov (%p30_p12, %s29_s29), 0  ;;  %s1296_s30 = smov (!%p30_p12, %s32_s30), %s930_s21 }
  0x2b   : > { %1267 = sst [smem:[#allocation25_spill]] %s1294_s29  ;;  %s576_s4 = sshll.u32 %s1294_s29, 1 }
  0x2c   : > { %p50_p8 = scmp.ne.s32.totalorder %s914_s17, %s910_s16  ;;  %p34_p13 = scmp.ge.s32.totalorder %s1296_s30, 2 }
  0x2d   : > { %p56_p2 = scmp.ne.s32.totalorder %s910_s16, %s906_s15  ;;  %s153_s12 = sand.u32 1, %s914_s17  }
  0x2e   : > { %p1083_p3 = por %p51_p0, %p50_p8  ;;  %s1298_s30 = smov (%p34_p13, %s1296_s30), 0 }
  0x2f   : > { %p1092_p5 = por %p57_p1, %p56_p2  ;;  %s39_s15 = sadd.s32 %s576_s4, %s1298_s30 }
  0x30   : > { %s66_s5 = ssub.s32 %s930_s21, %s1298_s30  ;;  %s40_s28 = ssub.s32 %s37_s10, %s39_s15 }
  0x31   : > { %p67_p0 = scmp.eq.s32.totalorder %s66_s5, 0  ;;  %p41_p10 = scmp.eq.s32.totalorder %s40_s28, 0 }
  0x32   : > { %s580_s20 = sshll.u32 %s37_s10, 4  ;;  %s156_s3 = scalar_lea.vmem [#allocation10], %s153_s12 }
  0x33   : > { %s1102_s1 = scalar_select %p67_p0, %s902_s14, %s69_s8  }
  0x34   : > { %s1105_s29 = scalar_select %p41_p10, %s914_s17, %s43_s11  }
  0x35   : > { %s165_s18 = sshll.u32 %s156_s3, 4  ;;  %s163_s13 = scalar_lea.hbm %s1244_s0, %s580_s20  ;;  %s166_s18 = int_to_ptr.vmem [resolvable:$true] %s165_s18 }
  0x36   : > { %p1114_p1 = pnand %p638_p4, %p1083_p3  ;;  %s194_s28 = scalar_lea.vmem [#allocation15], %s1034_s27 }
  0x37   : > { %s201_s8 = sshll.u32 %s194_s28, 4  ;;  %s1271_s15 = sshll.u32 %s930_s21, 5  ;;  %s1126_s8 = int_to_ptr.vmem [resolvable:$true] %s201_s8 }
  0x38   : > { %s1124_s10 = scalar_lea.hbm %s1246_s2, %s1271_s15  ;;  %s154_s3 = scalar_lea.sflag [#allocation11], %s153_s12 }
  0x39   : > { %p772_p12 = pneg %p1114_p1  ;;  %s783_s19 = scalar_lea.vmem %s166_s18, 16 }
  0x3a   : > { %p784_p8 = scmp.ne.s32.totalorder %s166_s18, %s783_s19  ;;  %s937_s20 = smov [#allocation10]  }
  0x3b   : > { %s788_s24 = sshll.u32 %s937_s20, 4  ;;  %s789_s24 = int_to_ptr.vmem [resolvable:$false] %s788_s24 }
  0x3c   : > { %p786_p4 = pnand %p784_p8, %p772_p12  ;;  %s790_s27 = scalar_lea.vmem %s789_s24, 32 }
  0x3d   : > { %p791_p2 = scmp.lt.s32.totalorder %s166_s18, %s789_s24  ;;  %p792_p3 = scmp.lt.s32.totalorder %s790_s27, %s783_s19 }
  0x3e   : > { %p787_p13 = pneg %p786_p4 }
  0x3f   : > { %p793_p0 = por %p792_p3, %p791_p2 }
  0x41   : > { %p794_p10 = pnand %p793_p0, %p787_p13 }
  0x43   : > { %797 = shalt.err (!%p794_p10)
}
  0x44   : > { %631 = dma.hbm_to_vmem [thread:$0]  (!%p1114_p1), %s163_s13, 16, %s166_s18, %s154_s3  }
  0x45   : > { %s811_s6 = scalar_lea.vmem %s1126_s8, 32  ;;  %p1272_p12 = pneg %p1045_p7 }
  0x46   : > { %p812_p9 = scmp.ne.s32.totalorder %s1126_s8, %s811_s6  ;;  %s938_s12 = smov [#allocation15]  }
  0x47   : > { %s816_s28 = sshll.u32 %s938_s12, 4  ;;  %s817_s28 = int_to_ptr.vmem [resolvable:$false] %s816_s28 }
  0x48   : > { %p814_p8 = pnand %p812_p9, %p1272_p12  ;;  %s818_s15 = scalar_lea.vmem %s817_s28, 64 }
  0x49   : > { %p819_p2 = scmp.lt.s32.totalorder %s1126_s8, %s817_s28  ;;  %p820_p13 = scmp.lt.s32.totalorder %s818_s15, %s811_s6 }
  0x4a   : > { %p815_p4 = pneg %p814_p8 }
  0x4b   : > { %p821_p3 = por %p820_p13, %p819_p2 }
  0x4d   : > { %p822_p0 = pnand %p821_p3, %p815_p4 }
  0x4f   : > { %825 = shalt.err (!%p822_p0)
}
  0x50   : > { %637 = dma.hbm_to_vmem [thread:$0]  (!%p1045_p7), %s1124_s10, 32, %s1126_s8, %s1051_s9  }
  0x51   : > { %210 = sbr.rel (%p1064_p11) target bundleno = 521 (0x209), region = 32  ;;  %s212_s13 = sand.u32 (!%p1064_p11), 1, %s910_s16  }
  0x52   : > { %s213_s18 = scalar_lea.sflag (!%p1064_p11), [#allocation11], %s212_s13  ;;  %s215_s4 = scalar_lea.vmem (!%p1064_p11), [#allocation10], %s212_s13 }
  0x56   : > { %881 = dma.done.wait (%p1092_p5), %s213_s18, 16  }
  0x57   : > { %883 = vsyncadd (%p1092_p5), %s213_s18, 4294967280  ;;  %s1273_s11 = sld [smem:[#allocation20_spill]]  ;;  %s220_s5 = sand.u32 1, %s1016_s23  }
  0x58   : > { %s221_s9 = scalar_lea.sflag [#allocation14], %s220_s5 }
  0x5d   : > { %s222_s3 = sand.u32 1, %s1273_s11  }
  0x5e   : > { %s1152_s19 = sshll.u32 %s222_s3, 1 }
  0x5f   : > { %s224_s25 = scalar_lea.vmem [#allocation13], %s1152_s19 }
  0x60   : > { %885 = dma.done.wait (%p1028_p6), %s221_s9, 64  }
  0x61   : > { %887 = vsyncadd (%p1028_p6), %s221_s9, 4294967232  ;;  %s1275_s8 = sld [smem:[#allocation22_spill]]  ;;  %s233_s26 = scalar_lea.vmem [#allocation15], %s1152_s19 }
  0x62   : > { %s1276_s10 = sld [smem:[#allocation21_spill]] }
  0x67   : > { %p262_p7 = scmp.eq.s32.totalorder %s1275_s8, 0 }
  0x68   : > { %p263_p9 = scmp.eq.s32.totalorder %s1276_s10, 0 }
  0x6a   : > { %p264_p11 = pnand %p263_p9, %p262_p7 }
  0x6c   : > { %267 = sbr.rel (%p264_p11) target bundleno = 118 (0x76), region = 48 }
  0x71   : > { %v939_v0 = vmov 0.0  }
  0x72   : > { %268 = vst [vmem:[#allocation2] sm:$0x3] %v939_v0  ;;  %269 = vst [vmem:[#allocation3] sm:$0x3] %v939_v0 }
  0x73   : > { %270 = vst [vmem:[#allocation4] sm:$0x3] %v939_v0  ;;  %271 = vst [vmem:[#allocation5] sm:$0x3] %v939_v0 }
  0x74   : > { %272 = vst [vmem:[#allocation6] sm:$0x3] %v939_v0  ;;  %273 = vst [vmem:[#allocation7] sm:$0x3] %v939_v0 }
  0x75   : > { %274 = vst [vmem:[#allocation8] sm:$0x3] %v939_v0  ;;  %275 = vst [vmem:[#allocation9] sm:$0x3] %v939_v0 }
  0x76 PF: > { %v276_v1 = vld [vmem:[%s215_s4] sm:$0x1]  ;;  %s1277_s20 = sld [smem:[#allocation21_spill]] }
  0x77   : > { %v277_v2 = vunpack.c.l.bf16 %v276_v1 }
  0x79   : > { %v588_v3 = vmul.f32 -1.442695, %v277_v2 }
  0x7b   : > { %732 = vpow2.f32 %v588_v3 }
  0x7c   : > { %p589_p6 = scmp.ne.s32.totalorder %s1277_s20, 0 }
  0x88   : > { %v733_v4 = vpop.eup %732 }
  0x89   : > { %v281_v5 = vadd.f32 1.0, %v733_v4 }
  0x8b   : > { %734 = vrcp.f32 %v281_v5 }
  0x94   : > { %286 = sbr.rel (%p589_p6) target bundleno = 159 (0x9f), region = 52 }
  0x98   : > { %v735_v6 = vpop.eup %734 }
  0x99   : > { %v287_v7 = vld [vmem:[%s224_s25] sm:$0x3]  ;;  %v288_v8 = vld [vmem:[#allocation2] sm:$0x3]  ;;  %v292_v9 = vld [vmem:[#allocation3] sm:$0x3] }
  0x9a   : > { %v289_v10 = vmul.f32 %v735_v6, %v287_v7  ;;  %v293_v11 = vadd.f32 %v735_v6, %v292_v9  ;;  %v295_v12 = vld [vmem:[#allocation8] sm:$0x3] }
  0x9b   : > { %v296_v13 = vadd.f32 %v295_v12, %v287_v7 }
  0x9c   : > { %v290_v14 = vadd.f32 %v289_v10, %v288_v8  ;;  %294 = vst [vmem:[#allocation3] sm:$0x3] %v293_v11 }
  0x9d   : > { %297 = vst [vmem:[#allocation8] sm:$0x3] %v296_v13 }
  0x9e   : > { %291 = vst [vmem:[#allocation2] sm:$0x3] %v290_v14 }
  0x9f PF: > { %s1278_s24 = sld [smem:[#allocation21_spill]] }
  0xa5   : > { %p590_p5 = scmp.ne.s32.totalorder %s1278_s24, 1 }
  0xa7   : > { %301 = sbr.rel (%p590_p5) target bundleno = 178 (0xb2), region = 56 }
  0xac   : > { %v302_v15 = vld [vmem:[%s233_s26] sm:$0x3]  ;;  %v303_v16 = vld [vmem:[#allocation4] sm:$0x3]  ;;  %v307_v17 = vld [vmem:[#allocation5] sm:$0x3] }
  0xad   : > { %v304_v18 = vmul.f32 %v735_v6, %v302_v15  ;;  %v308_v19 = vadd.f32 %v735_v6, %v307_v17  ;;  %v310_v20 = vld [vmem:[#allocation9] sm:$0x3] }
  0xae   : > { %v311_v21 = vadd.f32 %v310_v20, %v302_v15 }
  0xaf   : > { %v305_v22 = vadd.f32 %v304_v18, %v303_v16  ;;  %309 = vst [vmem:[#allocation5] sm:$0x3] %v308_v19 }
  0xb0   : > { %312 = vst [vmem:[#allocation9] sm:$0x3] %v311_v21 }
  0xb1   : > { %306 = vst [vmem:[#allocation4] sm:$0x3] %v305_v22 }
  0xb2 PF: > { %s1279_s27 = sld [smem:[#allocation21_spill]] }
  0xb8   : > { %p313_p1 = scmp.eq.s32.totalorder %s1279_s27, 2  ;;  %p591_p10 = scmp.ne.s32.totalorder %s1279_s27, 2 }
  0xba   : > { %316 = sbr.rel (%p591_p10) target bundleno = 199 (0xc7), region = 60 }
  0xbf   : > { %v317_v23 = vld [vmem:[%s224_s25] sm:$0x3]  ;;  %v323_v24 = vld [vmem:[#allocation7] sm:$0x3]  ;;  %v318_v27 = vld [vmem:[#allocation6] sm:$0x3] }
  0xc0   : > { %v319_v25 = vsub.f32 1.0, %v317_v23  ;;  %v324_v26 = vadd.f32 %v735_v6, %v323_v24 }
  0xc2   : > { %v320_v28 = vmul.f32 %v735_v6, %v319_v25  ;;  %325 = vst [vmem:[#allocation7] sm:$0x3] %v324_v26 }
  0xc4   : > { %v321_v29 = vadd.f32 %v320_v28, %v318_v27 }
  0xc6   : > { %322 = vst [vmem:[#allocation6] sm:$0x3] %v321_v29 }
  0xc7 PF: > { %s1280_s6 = sld [smem:[#allocation22_spill]] }
  0xcd   : > { %p326_p12 = scmp.eq.s32.totalorder %s1280_s6, 1 }
  0xcf   : > { %p327_p8 = pnand %p326_p12, %p313_p1 }
  0xd0   : > { %s940_s25 = smov (!%p327_p8), 1e-07  }
  0xd1   : > { %330 = sbr.rel (%p327_p8) target bundleno = 510 (0x1fe), region = 64 }
  0xd6   : > { %vm332_vm0 = vcmask 1041408   ;;  %v354_v30 = vld [vmem:[#allocation4] sm:$0x3]  ;;  %v331_v31 = vld [vmem:[#allocation2] sm:$0x3] }
  0xd7   : > { %v355_v32 = vsel %vm332_vm0, %v354_v30, 0.0  ;;  %v333_v33 = vsel %vm332_vm0, %v331_v31, 0.0  ;;  %v365_v34 = vld [vmem:[#allocation5] sm:$0x3]  ;;  %v343_v35 = vld [vmem:[#allocation3] sm:$0x3] }
  0xd8   : > { %356 = vadd.xlane.f32.xlu1 %v355_v32  ;;  %334 = vadd.xlane.f32.xlu0 %v333_v33  ;;  %v366_v36 = vsel %vm332_vm0, %v365_v34, 0.0  ;;  %v344_v37 = vsel %vm332_vm0, %v343_v35, 0.0  ;;  %v387_v38 = vld [vmem:[#allocation7] sm:$0x3]  ;;  %v376_v39 = vld [vmem:[#allocation6] sm:$0x3] }
  0xd9   : > { %v388_v40 = vsel %vm332_vm0, %v387_v38, 0.0  ;;  %v377_v41 = vsel %vm332_vm0, %v376_v39, 0.0  ;;  %v409_v42 = vld [vmem:[#allocation9] sm:$0x3]  ;;  %v398_v43 = vld [vmem:[#allocation8] sm:$0x3] }
  0xda   : > { %v410_v44 = vsel %vm332_vm0, %v409_v42, 0.0  ;;  %v399_v45 = vsel %vm332_vm0, %v398_v43, 0.0 }
  0xdc   : > { %367 = vadd.xlane.f32.xlu1 %v366_v36  ;;  %345 = vadd.xlane.f32.xlu0 %v344_v37 }
  0xe0   : > { %389 = vadd.xlane.f32.xlu1 %v388_v40  ;;  %378 = vadd.xlane.f32.xlu0 %v377_v41 }
  0xe4   : > { %411 = vadd.xlane.f32.xlu1 %v410_v44  ;;  %400 = vadd.xlane.f32.xlu0 %v399_v45 }
 0x161   : > { %v357_v46 = vpop.xlane.xlu1 %356  ;;  %v335_v47 = vpop.xlane.xlu0 %334 }
 0x162   : > { %v358_v48 = vrot.slane %v357_v46, 4  ;;  %v336_v49 = vrot.slane %v335_v47, 4 }
 0x164   : > { %v359_v50 = vadd.f32 %v358_v48, %v357_v46  ;;  %v337_v51 = vadd.f32 %v336_v49, %v335_v47 }
 0x165   : > { %v368_v52 = vpop.xlane.xlu1 %367  ;;  %v346_v53 = vpop.xlane.xlu0 %345 }
 0x166   : > { %v360_v54 = vrot.slane %v359_v50, 2  ;;  %v338_v55 = vrot.slane %v337_v51, 2  ;;  %v369_v56 = vrot.slane %v368_v52, 4  ;;  %v347_v57 = vrot.slane %v346_v53, 4 }
 0x168   : > { %v370_v58 = vadd.f32 %v369_v56, %v368_v52  ;;  %v348_v59 = vadd.f32 %v347_v57, %v346_v53  ;;  %v339_v60 = vadd.f32 %v338_v55, %v337_v51  ;;  %v361_v63 = vadd.f32 %v360_v54, %v359_v50 }
 0x169   : > { %v390_v61 = vpop.xlane.xlu1 %389  ;;  %v379_v62 = vpop.xlane.xlu0 %378 }
 0x16a   : > { %v371_v0 = vrot.slane %v370_v58, 2  ;;  %v349_v1 = vrot.slane %v348_v59, 2  ;;  %v391_v2 = vrot.slane %v390_v61, 4  ;;  %v380_v3 = vrot.slane %v379_v62, 4 }
 0x16b   : > { %v340_v4 = vrot.slane %v339_v60, 1  ;;  %v362_v12 = vrot.slane %v361_v63, 1 }
 0x16c   : > { %v392_v5 = vadd.f32 %v391_v2, %v390_v61  ;;  %v381_v6 = vadd.f32 %v380_v3, %v379_v62  ;;  %v350_v7 = vadd.f32 %v349_v1, %v348_v59  ;;  %v372_v8 = vadd.f32 %v371_v0, %v370_v58 }
 0x16d   : > { %v412_v9 = vpop.xlane.xlu1 %411  ;;  %v401_v10 = vpop.xlane.xlu0 %400  ;;  %v341_v11 = vadd.f32 %v340_v4, %v339_v60  ;;  %v363_v24 = vadd.f32 %v362_v12, %v361_v63 }
 0x16e   : > { %v393_v13 = vrot.slane %v392_v5, 2  ;;  %v382_v14 = vrot.slane %v381_v6, 2  ;;  %v413_v15 = vrot.slane %v412_v9, 4  ;;  %v402_v16 = vrot.slane %v401_v10, 4 }
 0x16f   : > { %596 = vpush %v341_v11  ;;  %v351_v17 = vrot.slane %v350_v7, 1  ;;  %v373_v18 = vrot.slane %v372_v8, 1 }
 0x170   : > { %v414_v19 = vadd.f32 %v413_v15, %v412_v9  ;;  %v403_v20 = vadd.f32 %v402_v16, %v401_v10  ;;  %v383_v21 = vadd.f32 %v382_v14, %v381_v6  ;;  %v394_v22 = vadd.f32 %v393_v13, %v392_v5 }
 0x171   : > { %v352_v23 = vadd.f32 %v351_v17, %v350_v7  ;;  %v374_v25 = vadd.f32 %v373_v18, %v372_v8 }
 0x172   : > { %v415_v26 = vrot.slane %v414_v19, 2  ;;  %v404_v27 = vrot.slane %v403_v20, 2  ;;  %v384_v28 = vrot.slane %v383_v21, 1  ;;  %v395_v29 = vrot.slane %v394_v22, 1 }
 0x173   : > { %598 = vpush %v352_v23 }
 0x174   : > { %v416_v30 = vadd.f32 %v415_v26, %v414_v19  ;;  %v405_v31 = vadd.f32 %v404_v27, %v403_v20  ;;  %600 = vpush %v363_v24  ;;  %v385_v32 = vadd.f32 %v384_v28, %v383_v21  ;;  %v396_v33 = vadd.f32 %v395_v29, %v394_v22 }
 0x175   : > { %602 = vpush %v374_v25 }
 0x176   : > { %604 = vpush %v385_v32  ;;  %v406_v34 = vrot.slane %v405_v31, 1  ;;  %v417_v35 = vrot.slane %v416_v30, 1 }
 0x177   : > { %606 = vpush %v396_v33 }
 0x178   : > { %v407_v36 = vadd.f32 %v406_v34, %v405_v31  ;;  %v418_v37 = vadd.f32 %v417_v35, %v416_v30 }
 0x17a   : > { %608 = vpush %v407_v36 }
 0x17b   : > { %610 = vpush %v418_v37 }
 0x1a0   : > { %s1183_s28 = spop %596 }
 0x1a1   : > { %s421_s24 = smul.f32 2.0, %s1183_s28 }
 0x1a4   : > { %s599_s15 = spop %598 }
 0x1a5   : > { %s1185_s13 = spop %600 }
 0x1a6   : > { %s603_s18 = spop %602  ;;  %s448_s27 = smul.f32 2.0, %s1185_s13 }
 0x1a7   : > { %s1187_s4 = spop %604 }
 0x1a8   : > { %s607_s11 = spop %606  ;;  %s434_s6 = smul.f32 2.0, %s1187_s4 }
 0x1ab   : > { %s1189_s7 = spop %608 }
 0x1ac   : > { %s420_s5 = ssub.f32 512.0, %s1189_s7  ;;  %s1193_s19 = spop %610 }
 0x1ad   : > { %s423_s3 = sadd.f32 %s1189_s7, %s599_s15  ;;  %p430_p4 = scmp.gt.f32.partialorder %s1189_s7, 0.0 }
 0x1ae   : > { %s436_s9 = sadd.f32 %s607_s11, %s420_s5  ;;  %p457_p2 = scmp.gt.f32.partialorder %s1193_s19, 0.0 }
 0x1af   : > { %s425_s8 = smax.f32 %s940_s25, %s423_s3  ;;  %s450_s10 = sadd.f32 %s1193_s19, %s603_s18 }
 0x1b0   : > { %v426_v38 = vstv %s425_s8  ;;  %s438_s26 = smax.f32 %s940_s25, %s436_s9  ;;  %p443_p13 = scmp.gt.f32.partialorder %s420_s5, 0.0 }
 0x1b1   : > { %736 = vrcp.f32 %v426_v38  ;;  %v439_v39 = vstv %s438_s26  ;;  %s452_s20 = smax.f32 %s940_s25, %s450_s10 }
 0x1b2   : > { %738 = vrcp.f32 %v439_v39  ;;  %v453_v40 = vstv %s452_s20 }
 0x1b3   : > { %740 = vrcp.f32 %v453_v40 }
 0x1be   : > { %v737_v41 = vpop.eup %736 }
 0x1bf   : > { %v739_v42 = vpop.eup %738  ;;  %612 = vpush %v737_v41 }
 0x1c0   : > { %v741_v43 = vpop.eup %740  ;;  %614 = vpush %v739_v42 }
 0x1c1   : > { %616 = vpush %v741_v43 }
 0x1f0   : > { %s613_s12 = spop %612 }
 0x1f1   : > { %s429_s15 = smul.f32 %s613_s12, %s421_s24  ;;  %s615_s18 = spop %614 }
 0x1f2   : > { %s442_s11 = smul.f32 %s615_s18, %s434_s6  ;;  %s617_s3 = spop %616 }
 0x1f3   : > { %s431_s9 = ssub.f32 1.0, %s429_s15  ;;  %s456_s25 = smul.f32 %s617_s3, %s448_s27 }
 0x1f4   : > { %s444_s8 = ssub.f32 1.0, %s442_s11 }
 0x1f5   : > { %s1300_s9 = smov (!%p430_p4, %s431_s9), 0.0  ;;  %s458_s26 = ssub.f32 1.0, %s456_s25 }
 0x1f6   : > { %s1302_s8 = smov (!%p443_p13, %s444_s8), 0.0  ;;  %s433_s10 = smul.f32 0.5, %s1300_s9 }
 0x1f7   : > { %s446_s28 = smul.f32 0.1, %s1302_s8  ;;  %s1304_s26 = smov (!%p457_p2, %s458_s26), 0.0 }
 0x1f8   : > { %s460_s4 = smul.f32 0.1, %s1304_s26 }
 0x1f9   : > { %s447_s13 = sadd.f32 %s446_s28, %s433_s10 }
 0x1fb   : > { %s461_s20 = sadd.f32 %s460_s4, %s447_s13 }
 0x1fd   : > { %463 = sst [smem:[#allocation16]] %s461_s20 }
 0x1fe PF: > { %p639_p3 = scmp.eq.s32.totalorder %s1016_s23, 5  ;;  %s941_s24 = smov [#allocation16]  }
 0x1ff   : > { %s1282_s7 = sld [smem:[#allocation27_spill]] }
 0x205   : > { %625 = dma.smem_to_hbm (%p639_p3), %s941_s24, 16, %s1282_s7, [#allocation12]  }
 0x206   : > { %889 = dma.done.wait (%p639_p3), [#allocation12], 16  }
 0x207   : > { %891 = vsyncadd (%p639_p3), [#allocation12], 4294967280 }
 0x208   : > { %477 = sfence }
 0x209 PF: > { %s20_s22 = sadd.s32 1, %s934_s22   ;;  %s1283_s12 = sld [smem:[#allocation20_spill]] }
 0x20a   : > { %p17_p0 = scmp.ge.s32.totalorder %s20_s22, 8   ;;  %s1284_s18 = sld [smem:[#allocation23_spill]] }
 0x20b   : > { %s1285_s20 = sld [smem:[#allocation25_spill]]  ;;  %s1286_s13 = smov %s902_s14 }
 0x20c   : > { %s1287_s14 = smov %s1102_s1  ;;  %s1288_s15 = smov %s910_s16 }
 0x20d   : > { %s1289_s16 = smov %s914_s17  ;;  %s1290_s17 = smov %s1105_s29 }
 0x20e   : > { %s1291_s19 = smov %s930_s21  ;;  %s1292_s21 = smov %s1298_s30 }
 0x20f   :  { %19 = sbr.rel (!%p17_p0) target bundleno = 13 (0xd), region = 114 }
 0x214   :  { %483 = vsyncpa [#allocation11], 1 }
 0x215   :  { %485 = vsyncpa [#allocation11 + $0x1], 1 }
 0x216   :  { %486 = vsyncpa [#allocation14], 1 }
 0x217   :  { %488 = vsyncpa [#allocation14 + $0x1], 1 }
 0x218   :  { %489 = vsyncpa [#allocation12], 1 }
 0x219   :  { %491 = vsyncpa [#allocation12 + $0x1], 1 }

</bundles_post_ra>
